<compile_context>
chip_gen: v7x
topology: tpu7x:2x2x1
jax: 0.10.0
libtpu: 0.0.40
codegen_flags: <defaults>
</compile_context>

<pallas_src>
import functools

import jax
import jax.numpy as jnp
from jax import lax
from jax.experimental import pallas as pl
from jax.experimental.pallas import tpu as pltpu

LANES = 128
ACC_ROWS = 32                 # accumulator rows; also covers f32/bf16/int8 sublane packing
_DEFAULT_TILE_BYTES = 2 * 1024 * 1024   # per-input tile; fits every chip's scoped-VMEM default
_V7X_TILE_BYTES = 4 * 1024 * 1024       # v7x: ~3.2 TB/s HBM needs bigger tiles to amortize step cost
_ROW_TILE_ELEMS = 64 * 1024             # unaligned fallback path tile (elements)


def _round_up(x, m):
    return (x + m - 1) // m * m


def _per_input_tile_bytes():
    try:
        kind = jax.devices()[0].device_kind.lower()
    except Exception:
        return _DEFAULT_TILE_BYTES
    if "v7" in kind or "7x" in kind:
        return _V7X_TILE_BYTES
    return _DEFAULT_TILE_BYTES


def _cost_estimate(n_elems, t_dtype, p_dtype):
    bytes_in = n_elems * (jnp.dtype(t_dtype).itemsize + jnp.dtype(p_dtype).itemsize)
    return pl.CostEstimate(flops=3 * n_elems, transcendentals=0,
                           bytes_accessed=bytes_in + 4)


# --------------------------------------------------------------------------
# Main kernel: lane-aligned sizes, (rows, 128) view, streaming reduction.
# --------------------------------------------------------------------------
def _mse_kernel(t_ref, p_ref, out_ref, acc_ref, *, tile_rows, valid_rows,
                inv_n, mask_needed):
    i = pl.program_id(0)
    nb = pl.num_programs(0)

    @pl.when(i == 0)
    def _():
        acc_ref[...] = jnp.zeros_like(acc_ref)

    # In-kernel cast (no wrapper-side astype copies).
    d = p_ref[...].astype(jnp.float32) - t_ref[...].astype(jnp.float32)
    sq = d * d

    def accumulate(vals):
        # Pure VPU adds into a (32, 128) per-lane accumulator: 4 independent
        # f32 accumulation streams, no cross-lane work in the hot loop.
        acc_ref[...] += jnp.sum(
            vals.reshape(tile_rows // ACC_ROWS, ACC_ROWS, LANES), axis=0)

    if mask_needed:
        # Static flag: only emitted when the last block is partial.  The mask
        # itself only runs on that final block (fast unmasked path otherwise).
        @pl.when(i < nb - 1)
        def _():
            accumulate(sq)

        @pl.when(i == nb - 1)
        def _():
            row_ids = i * tile_rows + lax.broadcasted_iota(jnp.int32, sq.shape, 0)
            # Keep this a select (not a multiply): out-of-bounds rows hold
            # unspecified (possibly NaN/Inf) data.
            accumulate(jnp.where(row_ids < valid_rows, sq, 0.0))
    else:
        accumulate(sq)

    @pl.when(i == nb - 1)
    def _():
        # Single cross-lane reduce + fused 1/N scaling, once.
        out_ref[0, 0] = jnp.sum(acc_ref[...]) * inv_n


def _mse_aligned(t_flat, p_flat, n_elems):
    rows = n_elems // LANES
    t2 = t_flat.reshape(rows, LANES)      # metadata-only reshapes
    p2 = p_flat.reshape(rows, LANES)

    # Dtype-aware tile rows from a byte budget (constant DMA granularity
    # across dtypes); rounded to ACC_ROWS for sublane / accumulator alignment.
    itemsize = max(jnp.dtype(t2.dtype).itemsize, jnp.dtype(p2.dtype).itemsize)
    budget_rows = max(ACC_ROWS,
                      (_per_input_tile_bytes() // (LANES * itemsize)) // ACC_ROWS * ACC_ROWS)
    tile_rows = min(budget_rows, _round_up(rows, ACC_ROWS))
    nb = pl.cdiv(rows, tile_rows)
    mask_needed = (rows % tile_rows) != 0

    kernel = functools.partial(
        _mse_kernel, tile_rows=tile_rows, valid_rows=rows,
        inv_n=1.0 / float(n_elems), mask_needed=mask_needed)

    out = pl.pallas_call(
        kernel,
        out_shape=jax.ShapeDtypeStruct((1, 1), jnp.float32),
        grid_spec=pltpu.PrefetchScalarGridSpec(
            num_scalar_prefetch=0,
            grid=(nb,),
            in_specs=[
                pl.BlockSpec((tile_rows, LANES), lambda i: (i, 0)),
                pl.BlockSpec((tile_rows, LANES), lambda i: (i, 0)),
            ],
            out_specs=pl.BlockSpec((1, 1), lambda i: (0, 0),
                                   memory_space=pltpu.SMEM),
            scratch_shapes=[pltpu.VMEM((ACC_ROWS, LANES), jnp.float32)],
        ),
        compiler_params=pltpu.CompilerParams(dimension_semantics=("arbitrary",)),
        cost_estimate=_cost_estimate(n_elems, t2.dtype, p2.dtype),
    )(t2, p2)
    return out[0, 0]


# --------------------------------------------------------------------------
# Fallback kernel: lane-unaligned sizes.  (1, N) view (metadata-only), tail
# lanes masked in-kernel — no wrapper-side jnp.pad full-array copy.
# --------------------------------------------------------------------------
def _mse_row_kernel(t_ref, p_ref, out_ref, acc_ref, *, tile_e, n_valid, inv_n):
    i = pl.program_id(0)

    @pl.when(i == 0)
    def _():
        acc_ref[...] = jnp.zeros_like(acc_ref)

    d = p_ref[...].astype(jnp.float32) - t_ref[...].astype(jnp.float32)
    sq = d * d
    idx = i * tile_e + lax.broadcasted_iota(jnp.int32, sq.shape, 1)
    # Select (not multiply): out-of-bounds lanes hold unspecified data.
    acc_ref[...] += jnp.where(idx < n_valid, sq, 0.0)

    @pl.when(i == pl.num_programs(0) - 1)
    def _():
        out_ref[0, 0] = jnp.sum(acc_ref[...]) * inv_n


def _mse_unaligned(t_flat, p_flat, n_elems):
    t2 = t_flat.reshape(1, n_elems)       # metadata-only
    p2 = p_flat.reshape(1, n_elems)

    tile_e = min(_ROW_TILE_ELEMS, _round_up(n_elems, LANES))
    nb = pl.cdiv(n_elems, tile_e)

    kernel = functools.partial(
        _mse_row_kernel, tile_e=tile_e, n_valid=n_elems,
        inv_n=1.0 / float(n_elems))

    out = pl.pallas_call(
        kernel,
        out_shape=jax.ShapeDtypeStruct((1, 1), jnp.float32),
        grid_spec=pltpu.PrefetchScalarGridSpec(
            num_scalar_prefetch=0,
            grid=(nb,),
            in_specs=[
                pl.BlockSpec((1, tile_e), lambda i: (0, i)),
                pl.BlockSpec((1, tile_e), lambda i: (0, i)),
            ],
            out_specs=pl.BlockSpec((1, 1), lambda i: (0, 0),
                                   memory_space=pltpu.SMEM),
            scratch_shapes=[pltpu.VMEM((1, tile_e), jnp.float32)],
        ),
        compiler_params=pltpu.CompilerParams(dimension_semantics=("arbitrary",)),
        cost_estimate=_cost_estimate(n_elems, t2.dtype, p2.dtype),
    )(t2, p2)
    return out[0, 0]


def mean_square_error(target, prediction):
    """Pallas equivalent of MeanSquareError.forward(target, prediction)."""
    assert target.shape == prediction.shape, (
        "shapes must match (no broadcasting in MSELoss default use)")
    n_elems = int(target.size)
    assert n_elems > 0

    # Flatten in native dtype (metadata reshape: no HBM copy, no dtype cast).
    t_flat = jnp.ravel(target)
    p_flat = jnp.ravel(prediction)

    if n_elems % LANES == 0:
        return _mse_aligned(t_flat, p_flat, n_elems)
    return _mse_unaligned(t_flat, p_flat, n_elems)


# --------------------------------------------------------------------------
# Self-test
# --------------------------------------------------------------------------
def _check(shape, key, dtype=jnp.float32, rtol=1e-5, atol=1e-6):
    k_t, k_p = jax.random.split(key)
    target = jax.random.normal(k_t, shape, dtype=jnp.float32).astype(dtype)
    prediction = jax.random.normal(k_p, shape, dtype=jnp.float32).astype(dtype)
    loss = jax.block_until_ready(mean_square_error(target, prediction))
    ref = jnp.mean((prediction.astype(jnp.float32)
                    - target.astype(jnp.float32)) ** 2)
    assert jnp.allclose(loss, ref, rtol=rtol, atol=atol), (shape, dtype, loss, ref)
    return loss


if __name__ == "__main__":
    key = jax.random.PRNGKey(0)
    k0, k1, k2, k3 = jax.random.split(key, 4)

    # Primary small NCHW-shaped example (loss is shape-agnostic):
    # single partial row block -> gated tail mask.
    _check((2, 4, 16, 16), k0)

    # Lane-unaligned element count -> (1, N) fallback kernel, in-kernel lane mask.
    _check((3, 4, 30, 30), k1)

    # Larger size: multi-step accumulation with a partial final block
    # (fast unmasked path for all but the last grid step).
    _check((12, 4, 128, 128), k2)

    # bf16 inputs: exercises in-kernel cast + dtype-aware tile sizing.
    _check((8, 4, 64, 128), k3, dtype=jnp.bfloat16, rtol=1e-4, atol=1e-5)

    print("KERNEL_OK")
</pallas_src>

<mosaic_0001>
module attributes {stable_mosaic.version = 11 : i64} {
  func.func @_mse_kernel(%arg0: i32, %arg1: memref<32x128xf32, #tpu.memory_space<vmem>>, %arg2: memref<32x128xf32, #tpu.memory_space<vmem>>, %arg3: memref<1x1xf32, #tpu.memory_space<smem>>, %arg4: memref<32x128xf32, #tpu.memory_space<vmem>>) attributes {dimension_semantics = [#tpu.dimension_semantics<arbitrary>], iteration_bounds = array<i64: 1>, scalar_prefetch = 0 : i64, scratch_operands = 1 : i64, tpu.core_type = #tpu.core_type<tc>, window_params = [{transform_indices = @transform_0, window_bounds = array<i64: 32, 128>}, {transform_indices = @transform_1, window_bounds = array<i64: 32, 128>}, {transform_indices = @transform_2, window_bounds = array<i64: 1, 1>}]} {
    %c0_i32 = arith.constant 0 : i32
    %0 = arith.cmpi eq, %arg0, %c0_i32 : i32
    %1 = arith.extui %0 : i1 to i32
    %c0_i32_0 = arith.constant 0 : i32
    %2 = arith.cmpi ne, %1, %c0_i32_0 : i32
    scf.if %2 {
      %cst = arith.constant 0.000000e+00 : f32
      %16 = vector.broadcast %cst : f32 to vector<32x128xf32>
      %c0_10 = arith.constant 0 : index
      %c0_11 = arith.constant 0 : index
      %17 = vector.load %arg4[%c0_10, %c0_11] : memref<32x128xf32, #tpu.memory_space<vmem>>, vector<32x128xf32>
      tpu.vector_store %arg4[%c0_10, %c0_11], %16 {strides = array<i32>} : memref<32x128xf32, #tpu.memory_space<vmem>>, vector<32x128xf32>,
    } else {
    }
    %c0 = arith.constant 0 : index
    %c0_1 = arith.constant 0 : index
    %3 = vector.load %arg2[%c0, %c0_1] : memref<32x128xf32, #tpu.memory_space<vmem>>, vector<32x128xf32>
    %c0_2 = arith.constant 0 : index
    %c0_3 = arith.constant 0 : index
    %4 = vector.load %arg1[%c0_2, %c0_3] : memref<32x128xf32, #tpu.memory_space<vmem>>, vector<32x128xf32>
    %5 = arith.subf %3, %4 : vector<32x128xf32>
    %6 = arith.mulf %5, %5 : vector<32x128xf32>
    %c0_i32_4 = arith.constant 0 : i32
    %7 = arith.cmpi slt, %arg0, %c0_i32_4 : i32
    %8 = arith.extui %7 : i1 to i32
    %c0_i32_5 = arith.constant 0 : i32
    %9 = arith.cmpi ne, %8, %c0_i32_5 : i32
    scf.if %9 {
      %c0_10 = arith.constant 0 : index
      %c0_11 = arith.constant 0 : index
      %16 = vector.load %arg4[%c0_10, %c0_11] : memref<32x128xf32, #tpu.memory_space<vmem>>, vector<32x128xf32>
      %17 = vector.shape_cast %6 : vector<32x128xf32> to vector<1x32x128xf32>
      %cst = arith.constant dense<0.000000e+00> : vector<32x128xf32>
      %18 = vector.multi_reduction <add>, %17, %cst [0] : vector<1x32x128xf32> to vector<32x128xf32>
      %19 = arith.addf %16, %18 : vector<32x128xf32>
      %c0_12 = arith.constant 0 : index
      %c0_13 = arith.constant 0 : index
      %20 = vector.load %arg4[%c0_12, %c0_13] : memref<32x128xf32, #tpu.memory_space<vmem>>, vector<32x128xf32>
      tpu.vector_store %arg4[%c0_12, %c0_13], %19 {strides = array<i32>} : memref<32x128xf32, #tpu.memory_space<vmem>>, vector<32x128xf32>,
    } else {
    }
    %c0_i32_6 = arith.constant 0 : i32
    %10 = arith.cmpi eq, %arg0, %c0_i32_6 : i32
    %11 = arith.extui %10 : i1 to i32
    %c0_i32_7 = arith.constant 0 : i32
    %12 = arith.cmpi ne, %11, %c0_i32_7 : i32
    scf.if %12 {
      %c32_i32 = arith.constant 32 : i32
      %16 = arith.muli %arg0, %c32_i32 : i32
      %17 = tpu.iota {dimensions = array<i32: 0>} : vector<32x128xi32>
      %18 = vector.broadcast %16 : i32 to vector<32x128xi32>
      %19 = arith.addi %18, %17 : vector<32x128xi32>
      %c16_i32 = arith.constant 16 : i32
      %20 = vector.broadcast %c16_i32 : i32 to vector<32x128xi32>
      %21 = arith.cmpi slt, %19, %20 : vector<32x128xi32>
      %cst = arith.constant 0.000000e+00 : f32
      %22 = vector.broadcast %cst : f32 to vector<32x128xf32>
      %23 = arith.select %21, %6, %22 : vector<32x128xi1>, vector<32x128xf32>
      %c0_10 = arith.constant 0 : index
      %c0_11 = arith.constant 0 : index
      %24 = vector.load %arg4[%c0_10, %c0_11] : memref<32x128xf32, #tpu.memory_space<vmem>>, vector<32x128xf32>
      %25 = vector.shape_cast %23 : vector<32x128xf32> to vector<1x32x128xf32>
      %cst_12 = arith.constant dense<0.000000e+00> : vector<32x128xf32>
      %26 = vector.multi_reduction <add>, %25, %cst_12 [0] : vector<1x32x128xf32> to vector<32x128xf32>
      %27 = arith.addf %24, %26 : vector<32x128xf32>
      %c0_13 = arith.constant 0 : index
      %c0_14 = arith.constant 0 : index
      %28 = vector.load %arg4[%c0_13, %c0_14] : memref<32x128xf32, #tpu.memory_space<vmem>>, vector<32x128xf32>
      tpu.vector_store %arg4[%c0_13, %c0_14], %27 {strides = array<i32>} : memref<32x128xf32, #tpu.memory_space<vmem>>, vector<32x128xf32>,
    } else {
    }
    %c0_i32_8 = arith.constant 0 : i32
    %13 = arith.cmpi eq, %arg0, %c0_i32_8 : i32
    %14 = arith.extui %13 : i1 to i32
    %c0_i32_9 = arith.constant 0 : i32
    %15 = arith.cmpi ne, %14, %c0_i32_9 : i32
    scf.if %15 {
      %c0_10 = arith.constant 0 : index
      %c0_11 = arith.constant 0 : index
      %16 = vector.load %arg4[%c0_10, %c0_11] : memref<32x128xf32, #tpu.memory_space<vmem>>, vector<32x128xf32>
      %17 = vector.shape_cast %16 : vector<32x128xf32> to vector<1x32x128xf32>
      %cst = arith.constant dense<0.000000e+00> : vector<1xf32>
      %18 = vector.multi_reduction <add>, %17, %cst [1, 2] : vector<1x32x128xf32> to vector<1xf32>
      %19 = vector.shape_cast %18 : vector<1xf32> to vector<1x1x1xf32>
      %20 = vector.extract %19[0, 0, 0] : f32 from vector<1x1x1xf32>
      %cst_12 = arith.constant 4.8828125E-4 : f32
      %21 = arith.mulf %20, %cst_12 : f32
      %c0_13 = arith.constant 0 : index
      %c0_14 = arith.constant 0 : index
      %22 = memref.load %arg3[%c0_13, %c0_14] : memref<1x1xf32, #tpu.memory_space<smem>>
      memref.store %21, %arg3[%c0_13, %c0_14] : memref<1x1xf32, #tpu.memory_space<smem>>
    } else {
    }
    return
  }
  func.func @transform_0(%arg0: i32) -> (i32, i32) {
    %c0_i32 = arith.constant 0 : i32
    %c0_i32_0 = arith.constant 0 : i32
    return %arg0, %c0_i32 : i32, i32
  }
  func.func @transform_1(%arg0: i32) -> (i32, i32) {
    %c0_i32 = arith.constant 0 : i32
    %c0_i32_0 = arith.constant 0 : i32
    return %arg0, %c0_i32 : i32, i32
  }
  func.func @transform_2(%arg0: i32) -> (i32, i32) {
    %c0_i32 = arith.constant 0 : i32
    %c0_i32_0 = arith.constant 0 : i32
    %c0_i32_1 = arith.constant 0 : i32
    return %c0_i32, %c0_i32_0 : i32, i32
  }
}

</mosaic_0001>

<bundles_post_ra>
// kernel: tpu_custom_call.1
= control target key start
LH: loop header
LB: loop body
LE: loop exit
PB: predicated region body
PF: predicated region fallthrough
CT: control target
= control target key end

     0   :  { %7 = vsyncpa [#allocation4], 0  ;;  %s279_s0 = inlined_call_operand.hbm [shape: f32[16,128], index: 0, kind: input, shape index: {}]   ;;  %s280_s1 = inlined_call_operand.hbm [shape: f32[16,128], index: 1, kind: input, shape index: {}]   ;;  %s281_s2 = inlined_call_operand.hbm [shape: f32[1,1], index: 2, kind: output, shape index: {}]  }
   0x1   :  { %8 = vsyncpa [#allocation7], 0 }
   0x2   :  { %9 = vsyncpa [#allocation5], 0 }
   0x3   :  { %14 = vsyncadd [#allocation4], 256  ;;  %s223_s9 = smov [#allocation3]   ;;  %s163_s13 = scalar_lea.hbm %s279_s0, 256 }
   0x4   :  { %s15_s10 = sshll.u32 %s223_s9, 4  ;;  %p164_p0 = scmp.ne.s32.totalorder %s279_s0, %s163_s13  ;;  %s16_s10 = int_to_ptr.vmem [resolvable:$true] %s15_s10 }
   0x5   :  { %p167_p1 = scmp.lt.u32.totalorder %s163_s13, %s279_s0 }
   0x7   :  { %p169_p2 = pnand %p167_p1, %p164_p0 }
   0x9   :  { %172 = shalt.err (!%p169_p2)
}
   0xa   :  { %s173_s18 = scalar_lea.vmem %s16_s10, 256  ;;  %s177_s19 = scalar_lea.vmem %s16_s10, 512 }
   0xb   :  { %p174_p3 = scmp.ne.s32.totalorder %s16_s10, %s173_s18  ;;  %p178_p4 = scmp.lt.s32.totalorder %s16_s10, %s16_s10 }
   0xc   :  { %p179_p5 = scmp.lt.s32.totalorder %s177_s19, %s173_s18 }
   0xe   :  { %p180_p6 = por %p179_p5, %p178_p4 }
  0x10   :  { %p181_p7 = pnand %p180_p6, %p174_p3 }
  0x12   :  { %184 = shalt.err (!%p181_p7)
}
  0x13   :  { %s224_s20 = smov 128   ;;  %s225_s21 = smov 8  }
  0x14   :  { %21 = dma.hbm_to_vmem [thread:$0]  %s279_s0, 256, %s16_s10, [#allocation4], %s224_s20, %s224_s20, %s225_s21  }
  0x15   :  { %26 = vsyncadd [#allocation7], 256  ;;  %s226_s24 = smov [#allocation6]   ;;  %s185_s28 = scalar_lea.hbm %s280_s1, 256 }
  0x16   :  { %s27_s25 = sshll.u32 %s226_s24, 4  ;;  %p186_p8 = scmp.ne.s32.totalorder %s280_s1, %s185_s28  ;;  %s28_s25 = int_to_ptr.vmem [resolvable:$true] %s27_s25 }
  0x17   :  { %p189_p9 = scmp.lt.u32.totalorder %s185_s28, %s280_s1 }
  0x19   :  { %p191_p10 = pnand %p189_p9, %p186_p8 }
  0x1b   :  { %194 = shalt.err (!%p191_p10)
}
  0x1c   :  { %s195_s5 = scalar_lea.vmem %s28_s25, 256  ;;  %s199_s0 = scalar_lea.vmem %s28_s25, 512 }
  0x1d   :  { %p196_p11 = scmp.ne.s32.totalorder %s28_s25, %s195_s5  ;;  %p200_p12 = scmp.lt.s32.totalorder %s28_s25, %s28_s25 }
  0x1e   :  { %p201_p13 = scmp.lt.s32.totalorder %s199_s0, %s195_s5 }
  0x20   :  { %p202_p0 = por %p201_p13, %p200_p12 }
  0x22   :  { %p203_p1 = pnand %p202_p0, %p196_p11 }
  0x24   :  { %206 = shalt.err (!%p203_p1)
}
  0x25   :  { %33 = dma.hbm_to_vmem [thread:$0]  %s280_s1, 256, %s28_s25, [#allocation7], %s224_s20, %s224_s20, %s225_s21  }
  0x26   :  { %217 = dma.done.wait [#allocation4], 512  }
  0x27   :  { %218 = vsyncadd [#allocation4], 4294966784 }
  0x28   :  { %219 = dma.done.wait [#allocation7], 512  }
  0x29   :  { %220 = vsyncadd [#allocation7], 4294966784  ;;  %v48_v0 = vld [vmem:[#allocation6] sm:$0xff]  ;;  %v49_v1 = vld [vmem:[#allocation6 + $0x8] sm:$0xff]  ;;  %s207_s11 = scalar_lea.hbm %s281_s2, 16 }
  0x2a   :  { %v52_v2 = vld [vmem:[#allocation3] sm:$0xff]  ;;  %v53_v3 = vld [vmem:[#allocation3 + $0x8] sm:$0xff]  ;;  %p208_p2 = scmp.ne.s32.totalorder %s281_s2, %s207_s11  ;;  %p211_p3 = scmp.lt.u32.totalorder %s207_s11, %s281_s2 }
  0x2b   :  { %v56_v4 = vsub.f32 %v48_v0, %v52_v2  ;;  %v57_v5 = vsub.f32 %v49_v1, %v53_v3 }
  0x2c   :  { %p213_p4 = pnand %p211_p3, %p208_p2 }
  0x2d   :  { %v60_v6 = vmul.f32 %v56_v4, %v56_v4  ;;  %v61_v7 = vmul.f32 %v57_v5, %v57_v5 }
  0x2f   :  { %v126_v8 = vadd.f32 %v61_v7, %v60_v6 }
  0x31   :  { %129 = vadd.xlane.f32.xlu0 %v126_v8 }
  0xbe   :  { %v130_v9 = vpop.xlane.xlu0 %129 }
  0xbf   :  { %v131_v10 = vrot.slane %v130_v9, 4 }
  0xc1   :  { %v132_v11 = vadd.f32 %v131_v10, %v130_v9 }
  0xc3   :  { %v133_v12 = vrot.slane %v132_v11, 2 }
  0xc5   :  { %v134_v13 = vadd.f32 %v133_v12, %v132_v11 }
  0xc7   :  { %v135_v14 = vrot.slane %v134_v13, 1 }
  0xc9   :  { %v136_v15 = vadd.f32 %v135_v14, %v134_v13 }
  0xcb   :  { %156 = vpush %v136_v15 }
  0xfc   :  { %s157_s1 = spop %156 }
  0xfd   :  { %s138_s8 = smul.f32 0.00048828125, %s157_s1 }
  0xff   :  { %140 = sst [smem:[#allocation8]] %s138_s8 }
 0x100   :  { %216 = shalt.err (!%p213_p4)
}
 0x101   :  { %s227_s16 = smov [#allocation8]  }
 0x102   :  { %148 = dma.smem_to_hbm %s227_s16, 16, %s281_s2, [#allocation5]  }
 0x103   :  { %221 = dma.done.wait [#allocation5], 16  }
 0x104   :  { %222 = vsyncadd [#allocation5], 4294967280 }
 0x105   :  { %152 = sfence }
 0x106   :  { %153 = vsyncpa [#allocation4], 1 }
 0x107   :  { %154 = vsyncpa [#allocation7], 1 }
 0x108   :  { %155 = vsyncpa [#allocation5], 1 }

</bundles_post_ra>
